<compile_context>
chip_gen: v6e
topology: v6e:2x2x1
jax: 0.10.0
libtpu: 0.0.40
codegen_flags: <defaults>
</compile_context>

<pallas_src>
import functools

import jax
import jax.numpy as jnp
from jax.experimental import pallas as pl
from jax.experimental.pallas import tpu as pltpu


def _round_up(x, m):
    return ((x + m - 1) // m) * m


# ----------------------------------------------------------------------------
# Kernel body
# ----------------------------------------------------------------------------
def _gemm_epilogue_kernel(*refs, relu, mode):
    """A(TM,K) @ W(K,Coutp) on the MXU (f32 acc) + bias [+ shortcut] [+ ReLU].

    mode:
      'plain'    -> refs = (a, w, b, o)
      'residual' -> refs = (a, w, b, res, o)           identity shortcut (f32)
      'proj'     -> refs = (a, w, b, xs, wsc, bsc, o)  fused 1x1-conv shortcut
    """
    if mode == 'plain':
        a_ref, w_ref, b_ref, o_ref = refs
    elif mode == 'residual':
        a_ref, w_ref, b_ref, res_ref, o_ref = refs
    else:  # 'proj'
        a_ref, w_ref, b_ref, xs_ref, wsc_ref, bsc_ref, o_ref = refs

    acc = jnp.dot(a_ref[...], w_ref[...], preferred_element_type=jnp.float32)
    acc = acc + b_ref[...]
    if mode == 'residual':
        acc = acc + res_ref[...]
    elif mode == 'proj':
        sc = jnp.dot(xs_ref[...], wsc_ref[...],
                     preferred_element_type=jnp.float32)
        acc = acc + sc + bsc_ref[...]
    if relu:
        acc = jnp.maximum(acc, 0.0)
    o_ref[...] = acc.astype(o_ref.dtype)


# ----------------------------------------------------------------------------
# Per-generation tiling / VMEM budget
# ----------------------------------------------------------------------------
def _tpu_vmem_budget():
    """Returns (per-step VMEM budget bytes, vmem_limit_bytes, #TensorCores)."""
    kind = ""
    try:
        kind = jax.devices()[0].device_kind.lower()
    except Exception:
        pass
    cores = 2 if "v7" in kind else 1

    vmem_cap = None
    try:
        vmem_cap = int(pltpu.get_tpu_info().vmem_capacity_bytes)
    except Exception:
        vmem_cap = None
    if vmem_cap is None or vmem_cap <= 0:
        # v7x has 64 MiB per TensorCore; v4/v5e/v6e have 128 MiB.
        if "v7" in kind or kind == "":
            vmem_cap = 64 << 20        # conservative default
        else:
            vmem_cap = 128 << 20

    vmem_limit = min(96 << 20, (vmem_cap * 3) // 4)
    budget = (vmem_limit * 3) // 4
    return budget, vmem_limit, cores


# ----------------------------------------------------------------------------
# Fused GEMM + BN-epilogue wrapper
# ----------------------------------------------------------------------------
def _fused_conv_gemm(a, w_f32, bias_f32, *, relu, out_dtype,
                     residual=None, proj=None):
    """out = relu?( a @ (W*scale) + bias [+ shortcut] ) as a tiled Pallas call.

    a        : (M, K) bf16 im2col patches
    w_f32    : (K, Cout) f32, BN scale already folded in
    bias_f32 : (Cout,) f32 folded BN bias
    residual : optional (M, Cout) f32 identity-shortcut tensor
    proj     : optional (xs (M, Cin) , wsc (Cin, Cout) f32, bsc (Cout,) f32)
               fused 1x1-conv shortcut
    """
    M, K = a.shape
    Cout = w_f32.shape[1]
    out_itemsize = jnp.dtype(out_dtype).itemsize

    budget, vmem_limit, cores = _tpu_vmem_budget()
    Coutp = _round_up(Cout, 128)          # lane-dense output width

    # VMEM accounting: "fixed" = resident (constant-index) operands,
    # "per_row" = bytes per M row (double-buffered).
    fixed = 2 * K * Coutp * 2                                 # resident W (x2 bufs)
    per_row = 2 * K * 2 + 2 * Coutp * out_itemsize            # A + out
    cinp = None
    if residual is not None:
        per_row += 2 * Coutp * 4                              # f32 residual tile
    if proj is not None:
        cinp = _round_up(proj[0].shape[1], 128)
        fixed += 2 * cinp * Coutp * 2                         # resident W_sc
        per_row += 2 * cinp * 2                               # xs tile

    avail = max(budget - fixed, 4 << 20)
    TM = max(256, min(2048, (avail // per_row) // 256 * 256))
    TM = min(TM, _round_up(M, 256))
    if cores >= 2 and M > 256:            # keep both v7x TensorCores busy
        TM = min(TM, _round_up((M + 1) // 2, 256))
    Mp = _round_up(M, TM)

    a_p = jnp.pad(a, ((0, Mp - M), (0, 0)))
    w_p = jnp.pad(w_f32, ((0, 0), (0, Coutp - Cout))).astype(jnp.bfloat16)
    b_p = jnp.pad(bias_f32, (0, Coutp - Cout)).reshape(1, Coutp).astype(jnp.float32)

    inputs = [a_p, w_p, b_p]
    in_specs = [
        pl.BlockSpec((TM, K), lambda i: (i, 0)),
        pl.BlockSpec((K, Coutp), lambda i: (0, 0)),    # VMEM-resident weights
        pl.BlockSpec((1, Coutp), lambda i: (0, 0)),
    ]
    mode = 'plain'
    flops = 2 * Mp * K * Coutp
    bytes_accessed = (a_p.size * 2 + w_p.size * 2 + b_p.size * 4
                      + Mp * Coutp * out_itemsize)

    if residual is not None:
        mode = 'residual'
        res_p = jnp.pad(residual.astype(jnp.float32),
                        ((0, Mp - M), (0, Coutp - Cout)))
        inputs.append(res_p)
        in_specs.append(pl.BlockSpec((TM, Coutp), lambda i: (i, 0)))
        bytes_accessed += res_p.size * 4
    elif proj is not None:
        mode = 'proj'
        xs, wsc_f32, bsc_f32 = proj
        Cin = xs.shape[1]
        xs_p = jnp.pad(xs.astype(jnp.bfloat16),
                       ((0, Mp - M), (0, cinp - Cin)))
        wsc_p = jnp.pad(wsc_f32, ((0, cinp - Cin),
                                  (0, Coutp - Cout))).astype(jnp.bfloat16)
        bsc_p = jnp.pad(bsc_f32, (0, Coutp - Cout)).reshape(1, Coutp).astype(jnp.float32)
        inputs += [xs_p, wsc_p, bsc_p]
        in_specs += [
            pl.BlockSpec((TM, cinp), lambda i: (i, 0)),
            pl.BlockSpec((cinp, Coutp), lambda i: (0, 0)),   # resident W_sc
            pl.BlockSpec((1, Coutp), lambda i: (0, 0)),
        ]
        flops += 2 * Mp * cinp * Coutp
        bytes_accessed += xs_p.size * 2 + wsc_p.size * 2 + bsc_p.size * 4

    out = pl.pallas_call(
        functools.partial(_gemm_epilogue_kernel, relu=relu, mode=mode),
        out_shape=jax.ShapeDtypeStruct((Mp, Coutp), out_dtype),
        grid=(Mp // TM,),
        in_specs=in_specs,
        out_specs=pl.BlockSpec((TM, Coutp), lambda i: (i, 0)),
        compiler_params=pltpu.CompilerParams(
            dimension_semantics=("parallel",),
            vmem_limit_bytes=int(vmem_limit)),
        cost_estimate=pl.CostEstimate(flops=int(flops), transcendentals=0,
                                      bytes_accessed=int(bytes_accessed)),
    )(*inputs)

    return out[:M, :Cout]


# ----------------------------------------------------------------------------
# Host-side glue: im2col (bf16) and BN folding
# ----------------------------------------------------------------------------
def _im2col(x_nhwc, ksize, stride):
    # TODO(synk): move this 9-tap extraction into the kernel to cut A HBM reads ~9x.
    N, H, W, Cin = x_nhwc.shape
    pad = (ksize - 1) // 2
    Ho = (H + 2 * pad - ksize) // stride + 1
    Wo = (W + 2 * pad - ksize) // stride + 1
    xp = jnp.pad(x_nhwc, ((0, 0), (pad, pad), (pad, pad), (0, 0)))
    patches = []
    for ky in range(ksize):
        for kx in range(ksize):
            patches.append(
                xp[:, ky:ky + stride * (Ho - 1) + 1:stride,
                      kx:kx + stride * (Wo - 1) + 1:stride, :])
    a = jnp.concatenate(patches, axis=-1).reshape(N * Ho * Wo,
                                                  ksize * ksize * Cin)
    return a.astype(jnp.bfloat16), (N, Ho, Wo)


def fold_bn(gamma, beta, mean, var, eps=1e-5):
    s = gamma / jnp.sqrt(var + eps)
    return s, beta - mean * s


def _fold_conv_bn(w_oihw, bn):
    """OIHW conv weight + BN -> ((K, Cout) f32 scaled weight, (Cout,) f32 bias)."""
    s, b = fold_bn(**bn)
    Cout, Cin, kh, kw = w_oihw.shape
    w_mat = jnp.transpose(w_oihw, (2, 3, 1, 0)).reshape(kh * kw * Cin, Cout)
    return (w_mat.astype(jnp.float32) * s[None, :].astype(jnp.float32),
            b.astype(jnp.float32))


# ----------------------------------------------------------------------------
# BasicBlock forward
# ----------------------------------------------------------------------------
def init_basic_block(key, in_channels, out_channels, stride):
    ks = jax.random.split(key, 12)

    def bn_params(k):
        k1, k2, k3, k4 = jax.random.split(k, 4)
        return dict(
            gamma=1.0 + 0.1 * jax.random.normal(k1, (out_channels,), jnp.float32),
            beta=0.05 * jax.random.normal(k2, (out_channels,), jnp.float32),
            mean=0.1 * jax.random.normal(k3, (out_channels,), jnp.float32),
            var=0.5 + jax.random.uniform(k4, (out_channels,), jnp.float32),
        )

    p = {
        'w1': 0.1 * jax.random.normal(ks[0], (out_channels, in_channels, 3, 3),
                                      jnp.float32),
        'bn1': bn_params(ks[1]),
        'w2': 0.1 * jax.random.normal(ks[2], (out_channels, out_channels, 3, 3),
                                      jnp.float32),
        'bn2': bn_params(ks[3]),
    }
    if stride != 1 or in_channels != out_channels:
        p['w_sc'] = 0.1 * jax.random.normal(
            ks[4], (out_channels, in_channels, 1, 1), jnp.float32)
        p['bn_sc'] = bn_params(ks[5])
    return p


def basic_block_forward(x_nchw, p, *, stride, in_channels, out_channels):
    x = jnp.transpose(x_nchw, (0, 2, 3, 1))  # NCHW -> NHWC

    # conv1 + bn1 + relu  (bf16 intermediate to halve its HBM round trip)
    w1, b1 = _fold_conv_bn(p['w1'], p['bn1'])
    a1, (n, ho, wo) = _im2col(x, 3, stride)
    out1 = _fused_conv_gemm(a1, w1, b1, relu=True, out_dtype=jnp.bfloat16)
    out1_nhwc = out1.reshape(n, ho, wo, out_channels)

    # conv2 + bn2 + shortcut + relu — shortcut fused into the same kernel.
    w2, b2 = _fold_conv_bn(p['w2'], p['bn2'])
    a2, _ = _im2col(out1_nhwc, 3, 1)
    M = n * ho * wo

    if stride != 1 or in_channels != out_channels:
        wsc, bsc = _fold_conv_bn(p['w_sc'], p['bn_sc'])
        xs = x[:, ::stride, ::stride, :].reshape(M, in_channels)
        out = _fused_conv_gemm(a2, w2, b2, relu=True, out_dtype=jnp.float32,
                               proj=(xs, wsc, bsc))
    else:
        res = x.reshape(M, out_channels)      # identity shortcut kept in f32
        out = _fused_conv_gemm(a2, w2, b2, relu=True, out_dtype=jnp.float32,
                               residual=res)

    out = out.reshape(n, ho, wo, out_channels)
    return jnp.transpose(out, (0, 3, 1, 2))   # NHWC -> NCHW


def basic_block_reference(x_nchw, p, *, stride, in_channels, out_channels):
    """Pure-JAX (XLA, f32) reference for correctness checking."""
    def conv(x, w, s, k):
        pad = (k - 1) // 2
        return jax.lax.conv_general_dilated(
            x, w, (s, s), ((pad, pad), (pad, pad)),
            dimension_numbers=('NCHW', 'OIHW', 'NCHW'))

    def bn(x, b):
        s, bb = fold_bn(**b)
        return x * s[None, :, None, None] + bb[None, :, None, None]

    out = jax.nn.relu(bn(conv(x_nchw, p['w1'], stride, 3), p['bn1']))
    out = bn(conv(out, p['w2'], 1, 3), p['bn2'])
    if stride != 1 or in_channels != out_channels:
        sc = bn(conv(x_nchw, p['w_sc'], stride, 1), p['bn_sc'])
    else:
        sc = x_nchw
    return jax.nn.relu(out + sc)


if __name__ == "__main__":
    key = jax.random.PRNGKey(0)
    k_x, k_p, k_x2, k_p2 = jax.random.split(key, 4)

    # --- block with 1x1-conv projection shortcut (fused into the 2nd kernel) ---
    N, Cin, H, W = 2, 4, 16, 16
    Cout, stride = 8, 2
    x = jax.random.normal(k_x, (N, Cin, H, W), jnp.float32)
    params = init_basic_block(k_p, Cin, Cout, stride)

    out = basic_block_forward(x, params, stride=stride,
                              in_channels=Cin, out_channels=Cout)
    out = jax.block_until_ready(out)
    ref = jax.block_until_ready(
        basic_block_reference(x, params, stride=stride,
                              in_channels=Cin, out_channels=Cout))
    assert out.shape == (N, Cout, H // stride, W // stride), out.shape
    err = float(jnp.max(jnp.abs(out - ref)))
    assert jnp.allclose(out, ref, atol=5e-2, rtol=5e-2), err

    # --- block with identity shortcut (f32 residual path) ---
    C2 = 8
    x2 = jax.random.normal(k_x2, (N, C2, H, W), jnp.float32)
    params2 = init_basic_block(k_p2, C2, C2, 1)
    out2 = jax.block_until_ready(
        basic_block_forward(x2, params2, stride=1,
                            in_channels=C2, out_channels=C2))
    ref2 = jax.block_until_ready(
        basic_block_reference(x2, params2, stride=1,
                              in_channels=C2, out_channels=C2))
    assert out2.shape == (N, C2, H, W), out2.shape
    err2 = float(jnp.max(jnp.abs(out2 - ref2)))
    assert jnp.allclose(out2, ref2, atol=5e-2, rtol=5e-2), err2

    print("KERNEL_OK")
</pallas_src>

<mosaic_0001>
module attributes {stable_mosaic.version = 11 : i64} {
  func.func @_gemm_epilogue_kernel(%arg0: i32, %arg1: memref<256x36xbf16, #tpu.memory_space<vmem>>, %arg2: memref<36x128xbf16, #tpu.memory_space<vmem>>, %arg3: memref<1x128xf32, #tpu.memory_space<vmem>>, %arg4: memref<256x128xbf16, #tpu.memory_space<vmem>>) attributes {dimension_semantics = [#tpu.dimension_semantics<parallel>], iteration_bounds = array<i64: 1>, scalar_prefetch = 0 : i64, scratch_operands = 0 : i64, tpu.core_type = #tpu.core_type<tc>, window_params = [{transform_indices = @transform_0, window_bounds = array<i64: 256, 36>}, {pipeline_mode = #tpu.pipeline_mode<synchronous>, transform_indices = @transform_1, window_bounds = array<i64: 36, 128>}, {pipeline_mode = #tpu.pipeline_mode<synchronous>, transform_indices = @transform_2, window_bounds = array<i64: 1, 128>}, {transform_indices = @transform_3, window_bounds = array<i64: 256, 128>}]} {
    %c0 = arith.constant 0 : index
    %c0_0 = arith.constant 0 : index
    %0 = vector.load %arg1[%c0, %c0_0] : memref<256x36xbf16, #tpu.memory_space<vmem>>, vector<256x36xbf16>
    %c0_1 = arith.constant 0 : index
    %c0_2 = arith.constant 0 : index
    %1 = vector.load %arg2[%c0_1, %c0_2] : memref<36x128xbf16, #tpu.memory_space<vmem>>, vector<36x128xbf16>
    %cst = arith.constant dense<0.000000e+00> : vector<256x128xf32>
    %2 = tpu.matmul %0, %1, %cst {dimension_numbers = #tpu.dot_dimension_numbers<[1], [0], [0], [1], [0, 0, 1, 1], [], []>} : vector<256x36xbf16>, vector<36x128xbf16>, vector<256x128xf32> -> vector<256x128xf32>
    %c0_3 = arith.constant 0 : index
    %c0_4 = arith.constant 0 : index
    %3 = vector.load %arg3[%c0_3, %c0_4] : memref<1x128xf32, #tpu.memory_space<vmem>>, vector<1x128xf32>
    %4 = vector.broadcast %3 : vector<1x128xf32> to vector<256x128xf32>
    %5 = arith.addf %2, %4 : vector<256x128xf32>
    %cst_5 = arith.constant 0.000000e+00 : f32
    %6 = vector.broadcast %cst_5 : f32 to vector<256x128xf32>
    %7 = arith.maximumf %5, %6 : vector<256x128xf32>
    %8 = arith.truncf %7 : vector<256x128xf32> to vector<256x128xbf16>
    %c0_6 = arith.constant 0 : index
    %c0_7 = arith.constant 0 : index
    %9 = vector.load %arg4[%c0_6, %c0_7] : memref<256x128xbf16, #tpu.memory_space<vmem>>, vector<256x128xbf16>
    tpu.vector_store %arg4[%c0_6, %c0_7], %8 {strides = array<i32>} : memref<256x128xbf16, #tpu.memory_space<vmem>>, vector<256x128xbf16>,
    return
  }
  func.func @transform_0(%arg0: i32) -> (i32, i32) {
    %c0_i32 = arith.constant 0 : i32
    %c0_i32_0 = arith.constant 0 : i32
    return %arg0, %c0_i32 : i32, i32
  }
  func.func @transform_1(%arg0: i32) -> (i32, i32) {
    %c0_i32 = arith.constant 0 : i32
    %c0_i32_0 = arith.constant 0 : i32
    %c0_i32_1 = arith.constant 0 : i32
    return %c0_i32, %c0_i32_0 : i32, i32
  }
  func.func @transform_2(%arg0: i32) -> (i32, i32) {
    %c0_i32 = arith.constant 0 : i32
    %c0_i32_0 = arith.constant 0 : i32
    %c0_i32_1 = arith.constant 0 : i32
    return %c0_i32, %c0_i32_0 : i32, i32
  }
  func.func @transform_3(%arg0: i32) -> (i32, i32) {
    %c0_i32 = arith.constant 0 : i32
    %c0_i32_0 = arith.constant 0 : i32
    return %arg0, %c0_i32 : i32, i32
  }
}

</mosaic_0001>

<bundles_post_ra>
// kernel: tpu_custom_call.1
= control target key start
LH: loop header
LB: loop body
LE: loop exit
PB: predicated region body
PF: predicated region fallthrough
CT: control target
= control target key end

     0   :  { %vm204_vm0 = vcmask 1041408   ;;  %vm155_vm1 = vcmask 293888   ;;  %s1017_s0 = inlined_call_operand.vmem [shape: bf16[256,36], index: 0, kind: input, shape index: {}]   ;;  %s1018_s1 = inlined_call_operand.vmem [shape: bf16[36,128], index: 1, kind: input, shape index: {}]   ;;  %s1019_s2 = inlined_call_operand.vmem [shape: f32[1,128], index: 2, kind: input, shape index: {}]   ;;  %s1020_s3 = inlined_call_operand.hbm [shape: bf16[256,128], index: 3, kind: output, shape index: {}]  }
   0x1   :  { %v840_v0 = vld [vmem:[%s1018_s1 + $0x10] ss:$0 sps:$4 sm:$0x33]   ;;  %v841_v1 = vld [vmem:[%s1018_s1 + $0x8] sm:$0xff]   ;;  %v842_v3 = vld [vmem:[%s1018_s1] sm:$0xff]  }
   0x2   :  { %835 = vmatprep.subr.msk.bf16.mxu0 %vm204_vm0, %v840_v0  ;;  %836 = vmatprep.subr.msk.bf16.mxu1 %vm204_vm0, %v840_v0  ;;  %v206_v2 = vsel %vm204_vm0, %v840_v0, 0  ;;  %v843_v4 = vld [vmem:[%s1017_s0] sm:$0xff]   ;;  %v845_v6 = vld [vmem:[%s1017_s0 + $0x8] sm:$0xff]   ;;  %v847_v8 = vld [vmem:[%s1017_s0 + $0x10] sm:$0xff]  }
   0x3   :  { %792 = vmatpush3.bf16.msra.mxu0 %v206_v2  ;;  %832 = vmatpush3.bf16.msra.mxu1 %v206_v2  ;;  %v844_v5 = vld [vmem:[%s1017_s0 + $0x40] sm:$0xff]   ;;  %v846_v7 = vld [vmem:[%s1017_s0 + $0x48] sm:$0xff]   ;;  %v848_v9 = vld [vmem:[%s1017_s0 + $0x50] sm:$0xff]  }
   0x4   :  { %793 = vmatprep.subr.bf16.mxu0 %v841_v1  ;;  %830 = vmatprep.subr.bf16.mxu1 %v841_v1  ;;  %v849_v10 = vld [vmem:[%s1017_s0 + $0x18] sm:$0xff]   ;;  %v851_v12 = vld [vmem:[%s1017_s0 + $0x20] sm:$0xff]  }
   0x5   :  { %797 = vmatprep.mubr.msk.bf16.mxu0 %vm155_vm1, %v843_v4  ;;  %813 = vmatprep.mubr.msk.bf16.mxu1 %vm155_vm1, %v844_v5  ;;  %v850_v11 = vld [vmem:[%s1017_s0 + $0x58] sm:$0xff]   ;;  %v852_v13 = vld [vmem:[%s1017_s0 + $0x60] sm:$0xff]  }
   0x7   :  { %794 = vmatpush3.bf16.msra.mxu0 %v841_v1  ;;  %833 = vmatpush3.bf16.msra.mxu1 %v841_v1 }
   0x8   :  { %795 = vmatprep.subr.bf16.mxu0 %v842_v3  ;;  %831 = vmatprep.subr.bf16.mxu1 %v842_v3 }
   0xb   :  { %796 = vmatpush3.bf16.msra.mxu0 %v842_v3  ;;  %834 = vmatpush3.bf16.msra.mxu1 %v842_v3 }
   0xe   :  { %798 = vmatmul.mubr.msk.bf16.vlgmr.msra.gmra.mxu0 %vm155_vm1, %v845_v6  ;;  %814 = vmatmul.mubr.msk.bf16.vlgmr.msra.gmra.mxu1 %vm155_vm1, %v846_v7 }
   0xf   :  { %801 = vmatprep.mubr.msk.bf16.mxu0 %vm155_vm1, %v847_v8  ;;  %817 = vmatprep.mubr.msk.bf16.mxu1 %vm155_vm1, %v848_v9 }
  0x10   :  { %8 = vsyncpa [#allocation3], 0  ;;  %v853_v14 = vld [vmem:[%s1017_s0 + $0x28] sm:$0xff]   ;;  %v855_v16 = vld [vmem:[%s1017_s0 + $0x30] sm:$0xff]  }
  0x11   :  { %v854_v15 = vld [vmem:[%s1017_s0 + $0x68] sm:$0xff]   ;;  %v856_v17 = vld [vmem:[%s1017_s0 + $0x70] sm:$0xff]   ;;  %v857_v18 = vld [vmem:[%s1017_s0 + $0x38] sm:$0xff]  }
  0x12   :  { %v858_v19 = vld [vmem:[%s1017_s0 + $0x78] sm:$0xff]   ;;  %v980_v20 = vld [vmem:[%s1019_s2] ss:$0 sm:$0xff]  ;;  %s881_s0 = smov [#allocation2]  }
  0x13   :  { %s566_s2 = sshll.u32 %s881_s0, 4  ;;  %s567_s2 = int_to_ptr.vmem [resolvable:$true] %s566_s2 }
  0x14   :  { %s859_s23 = scalar_lea.vmem %s567_s2, 2048  ;;  %p864_p1 = scmp.lt.s32.totalorder %s567_s2, %s567_s2 }
  0x15   :  { %p860_p0 = scmp.ne.s32.totalorder %s567_s2, %s859_s23  ;;  %p865_p2 = scmp.lt.s32.totalorder %s859_s23, %s859_s23 }
  0x16   :  { %802 = vmatmul.mubr.msk.bf16.gmra.mxu0 %vm155_vm1, %v849_v10  ;;  %818 = vmatmul.mubr.msk.bf16.gmra.mxu1 %vm155_vm1, %v850_v11 }
  0x17   :  { %805 = vmatprep.mubr.msk.bf16.mxu0 %vm155_vm1, %v851_v12  ;;  %821 = vmatprep.mubr.msk.bf16.mxu1 %vm155_vm1, %v852_v13  ;;  %p866_p3 = por %p865_p2, %p864_p1 }
  0x19   :  { %p867_p4 = pnand %p866_p3, %p860_p0 }
  0x1e   :  { %806 = vmatmul.mubr.msk.bf16.gmra.mxu0 %vm155_vm1, %v853_v14  ;;  %822 = vmatmul.mubr.msk.bf16.gmra.mxu1 %vm155_vm1, %v854_v15 }
  0x1f   :  { %809 = vmatprep.mubr.msk.bf16.mxu0 %vm155_vm1, %v855_v16  ;;  %825 = vmatprep.mubr.msk.bf16.mxu1 %vm155_vm1, %v856_v17 }
  0x26   :  { %810 = vmatmul.mubr.msk.bf16.gmra.mxu0 %vm155_vm1, %v857_v18  ;;  %826 = vmatmul.mubr.msk.bf16.gmra.mxu1 %vm155_vm1, %v858_v19 }
  0xce   :  { %v799_v21 = vpop.f32.mrf.mxu0  ;;  %v815_v22 = vpop.f32.mrf.mxu1 }
  0xcf   :  { %v251_v23 = vadd.f32 %v799_v21, %v980_v20  ;;  %v315_v24 = vadd.f32 %v815_v22, %v980_v20 }
  0xd0   :  { %v242_v25 = vpop.f32.mrf.mxu0  ;;  %v306_v26 = vpop.f32.mrf.mxu1 }
  0xd1   :  { %v243_v27 = vadd.f32 %v980_v20, %v242_v25  ;;  %v307_v28 = vadd.f32 %v980_v20, %v306_v26  ;;  %v371_v33 = vmax.f32 %v251_v23, 0.0  ;;  %v387_v34 = vmax.f32 %v315_v24, 0.0 }
  0xd2   :  { %v800_v29 = vpop.f32.mrf.mxu0  ;;  %v816_v30 = vpop.f32.mrf.mxu1 }
  0xd3   :  { %v254_v31 = vadd.f32 %v800_v29, %v980_v20  ;;  %v318_v32 = vadd.f32 %v816_v30, %v980_v20  ;;  %v369_v41 = vmax.f32 %v243_v27, 0.0  ;;  %v385_v42 = vmax.f32 %v307_v28, 0.0 }
  0xd4   :  { %v245_v35 = vpop.f32.mrf.mxu0  ;;  %v309_v36 = vpop.f32.mrf.mxu1 }
  0xd5   :  { %v372_v37 = vmax.f32 %v254_v31, 0.0  ;;  %v388_v38 = vmax.f32 %v318_v32, 0.0  ;;  %v246_v39 = vadd.f32 %v980_v20, %v245_v35  ;;  %v310_v40 = vadd.f32 %v980_v20, %v309_v36 }
  0xd6   :  { %v803_v43 = vpop.f32.mrf.mxu0  ;;  %v819_v44 = vpop.f32.mrf.mxu1 }
  0xd7   :  { %v685_v45 = vpack.c.bf16 %v372_v37, %v371_v33  ;;  %v725_v46 = vpack.c.bf16 %v388_v38, %v387_v34  ;;  %v370_v47 = vmax.f32 %v246_v39, 0.0  ;;  %v386_v48 = vmax.f32 %v310_v40, 0.0 }
  0xd8   :  { %v267_v49 = vadd.f32 %v803_v43, %v980_v20  ;;  %v331_v50 = vadd.f32 %v819_v44, %v980_v20  ;;  %v258_v51 = vpop.f32.mrf.mxu0  ;;  %v322_v52 = vpop.f32.mrf.mxu1 }
  0xd9   :  { %757 = vst [vmem:[#allocation2 + $0x8] sm:$0xff] %v685_v45   ;;  %765 = vst [vmem:[#allocation2 + $0x48] sm:$0xff] %v725_v46   ;;  %v680_v53 = vpack.c.bf16 %v370_v47, %v369_v41  ;;  %v720_v54 = vpack.c.bf16 %v386_v48, %v385_v42  ;;  %v259_v55 = vadd.f32 %v980_v20, %v258_v51 }
  0xda   :  { %v323_v56 = vadd.f32 %v980_v20, %v322_v52  ;;  %v804_v57 = vpop.f32.mrf.mxu0  ;;  %v820_v58 = vpop.f32.mrf.mxu1  ;;  %v375_v61 = vmax.f32 %v267_v49, 0.0  ;;  %v391_v62 = vmax.f32 %v331_v50, 0.0 }
  0xdb   :  { %681 = vst [vmem:[#allocation2] sm:$0xff] %v680_v53   ;;  %764 = vst [vmem:[#allocation2 + $0x40] sm:$0xff] %v720_v54   ;;  %v270_v59 = vadd.f32 %v804_v57, %v980_v20  ;;  %v334_v60 = vadd.f32 %v820_v58, %v980_v20  ;;  %v373_v5 = vmax.f32 %v259_v55, 0.0 }
  0xdc   :  { %v261_v63 = vpop.f32.mrf.mxu0  ;;  %v325_v0 = vpop.f32.mrf.mxu1  ;;  %v389_v6 = vmax.f32 %v323_v56, 0.0 }
  0xdd   :  { %v376_v1 = vmax.f32 %v270_v59, 0.0  ;;  %v392_v2 = vmax.f32 %v334_v60, 0.0  ;;  %v262_v3 = vadd.f32 %v980_v20, %v261_v63  ;;  %v326_v4 = vadd.f32 %v980_v20, %v325_v0 }
  0xde   :  { %v807_v7 = vpop.f32.mrf.mxu0  ;;  %v823_v8 = vpop.f32.mrf.mxu1 }
  0xdf   :  { %v695_v9 = vpack.c.bf16 %v376_v1, %v375_v61  ;;  %v735_v10 = vpack.c.bf16 %v392_v2, %v391_v62  ;;  %v374_v11 = vmax.f32 %v262_v3, 0.0  ;;  %v390_v12 = vmax.f32 %v326_v4, 0.0 }
  0xe0   :  { %v283_v13 = vadd.f32 %v807_v7, %v980_v20  ;;  %v347_v14 = vadd.f32 %v823_v8, %v980_v20  ;;  %v274_v15 = vpop.f32.mrf.mxu0  ;;  %v338_v16 = vpop.f32.mrf.mxu1 }
  0xe1   :  { %759 = vst [vmem:[#allocation2 + $0x18] sm:$0xff] %v695_v9   ;;  %767 = vst [vmem:[#allocation2 + $0x58] sm:$0xff] %v735_v10   ;;  %v690_v17 = vpack.c.bf16 %v374_v11, %v373_v5  ;;  %v730_v18 = vpack.c.bf16 %v390_v12, %v389_v6  ;;  %v275_v19 = vadd.f32 %v980_v20, %v274_v15 }
  0xe2   :  { %v339_v21 = vadd.f32 %v980_v20, %v338_v16  ;;  %v808_v22 = vpop.f32.mrf.mxu0  ;;  %v824_v23 = vpop.f32.mrf.mxu1  ;;  %v379_v26 = vmax.f32 %v283_v13, 0.0  ;;  %v395_v27 = vmax.f32 %v347_v14, 0.0 }
  0xe3   :  { %758 = vst [vmem:[#allocation2 + $0x10] sm:$0xff] %v690_v17   ;;  %766 = vst [vmem:[#allocation2 + $0x50] sm:$0xff] %v730_v18   ;;  %v286_v24 = vadd.f32 %v808_v22, %v980_v20  ;;  %v350_v25 = vadd.f32 %v824_v23, %v980_v20  ;;  %v377_v34 = vmax.f32 %v275_v19, 0.0 }
  0xe4   :  { %v277_v28 = vpop.f32.mrf.mxu0  ;;  %v341_v29 = vpop.f32.mrf.mxu1  ;;  %v393_v35 = vmax.f32 %v339_v21, 0.0 }
  0xe5   :  { %v380_v30 = vmax.f32 %v286_v24, 0.0  ;;  %v396_v31 = vmax.f32 %v350_v25, 0.0  ;;  %v278_v32 = vadd.f32 %v980_v20, %v277_v28  ;;  %v342_v33 = vadd.f32 %v980_v20, %v341_v29 }
  0xe6   :  { %v811_v36 = vpop.f32.mrf.mxu0  ;;  %v827_v37 = vpop.f32.mrf.mxu1 }
  0xe7   :  { %v705_v38 = vpack.c.bf16 %v380_v30, %v379_v26  ;;  %v745_v39 = vpack.c.bf16 %v396_v31, %v395_v27  ;;  %v378_v40 = vmax.f32 %v278_v32, 0.0  ;;  %v394_v41 = vmax.f32 %v342_v33, 0.0 }
  0xe8   :  { %v299_v42 = vadd.f32 %v811_v36, %v980_v20  ;;  %v363_v43 = vadd.f32 %v827_v37, %v980_v20  ;;  %v290_v44 = vpop.f32.mrf.mxu0  ;;  %v354_v45 = vpop.f32.mrf.mxu1 }
  0xe9   :  { %761 = vst [vmem:[#allocation2 + $0x28] sm:$0xff] %v705_v38   ;;  %769 = vst [vmem:[#allocation2 + $0x68] sm:$0xff] %v745_v39   ;;  %v700_v46 = vpack.c.bf16 %v378_v40, %v377_v34  ;;  %v740_v47 = vpack.c.bf16 %v394_v41, %v393_v35  ;;  %v291_v48 = vadd.f32 %v980_v20, %v290_v44 }
  0xea   :  { %v355_v49 = vadd.f32 %v980_v20, %v354_v45  ;;  %v812_v50 = vpop.f32.mrf.mxu0  ;;  %v828_v51 = vpop.f32.mrf.mxu1  ;;  %v383_v54 = vmax.f32 %v299_v42, 0.0  ;;  %v399_v55 = vmax.f32 %v363_v43, 0.0 }
  0xeb   :  { %760 = vst [vmem:[#allocation2 + $0x20] sm:$0xff] %v700_v46   ;;  %768 = vst [vmem:[#allocation2 + $0x60] sm:$0xff] %v740_v47   ;;  %v302_v52 = vadd.f32 %v812_v50, %v980_v20  ;;  %v366_v53 = vadd.f32 %v828_v51, %v980_v20  ;;  %v381_v62 = vmax.f32 %v291_v48, 0.0 }
  0xec   :  { %v293_v56 = vpop.f32.mrf.mxu0  ;;  %v357_v57 = vpop.f32.mrf.mxu1  ;;  %v397_v63 = vmax.f32 %v355_v49, 0.0 }
  0xed   :  { %v384_v58 = vmax.f32 %v302_v52, 0.0  ;;  %v400_v59 = vmax.f32 %v366_v53, 0.0  ;;  %v294_v60 = vadd.f32 %v980_v20, %v293_v56  ;;  %v358_v61 = vadd.f32 %v980_v20, %v357_v57 }
  0xef   :  { %v715_v0 = vpack.c.bf16 %v384_v58, %v383_v54  ;;  %v755_v1 = vpack.c.bf16 %v400_v59, %v399_v55  ;;  %v382_v2 = vmax.f32 %v294_v60, 0.0  ;;  %v398_v3 = vmax.f32 %v358_v61, 0.0 }
  0xf1   :  { %763 = vst [vmem:[#allocation2 + $0x38] sm:$0xff] %v715_v0   ;;  %771 = vst [vmem:[#allocation2 + $0x78] sm:$0xff] %v755_v1   ;;  %v710_v4 = vpack.c.bf16 %v382_v2, %v381_v62  ;;  %v750_v5 = vpack.c.bf16 %v398_v3, %v397_v63 }
  0xf3   :  { %762 = vst [vmem:[#allocation2 + $0x30] sm:$0xff] %v710_v4   ;;  %770 = vst [vmem:[#allocation2 + $0x70] sm:$0xff] %v750_v5  }
  0xf4   :  { %870 = shalt.err (!%p867_p4)
}
  0xf5   :  { %s882_s24 = smov 64   ;;  %s883_s25 = smov 4  }
  0xf6   :  { %572 = dma.vmem_to_hbm [thread:$0]  %s567_s2, 2048, %s1020_s3, [#allocation3], %s882_s24, %s882_s24, %s883_s25  }
  0xf7   :  { %879 = dma.done.wait [#allocation3], 2048  }
  0xf8   :  { %880 = vsyncadd [#allocation3], 4294965248 }
  0xf9   :  { %576 = vsyncpa [#allocation3], 1 }

</bundles_post_ra>
